<compile_context>
chip_gen: v7x
topology: tpu7x:2x2x1
jax: 0.10.0
libtpu: 0.0.40
codegen_flags: <defaults>
</compile_context>

<pallas_src>
import functools

import jax
import jax.numpy as jnp
from jax import lax
from jax.experimental import pallas as pl
from jax.experimental.pallas import tpu as pltpu


# --------------------------------------------------------------------------- #
# Kernels
# --------------------------------------------------------------------------- #
def _normalize_rowwise_kernel(g_ref, out_ref, *, n_actions: int):
    """One payoff matrix per row (p >= 128 lanes): plain per-row reductions."""
    g = g_ref[...].astype(jnp.float32)                       # (TB, p)
    mean = jnp.mean(g, axis=-1, keepdims=True)
    gc = g - mean
    ss = jnp.sum(gc * gc, axis=-1, keepdims=True)            # squared Frobenius norm
    inv = jnp.where(ss > 0.0, lax.rsqrt(ss), jnp.float32(1.0))
    inv = inv * jnp.float32(n_actions)
    out_ref[...] = (gc * inv).astype(out_ref.dtype)


def _normalize_packed_kernel(s_ref, st_ref, g_ref, out_ref, *, n_actions: int, p: int):
    """k matrices packed per lane-dense row; segmented reductions on the MXU."""
    g = g_ref[...].astype(jnp.float32)                       # (TB, L), L = k*p
    S = s_ref[...]                                           # (L, k) 0/1 segment matrix
    St = st_ref[...]                                         # (k, L)
    hp = lax.Precision.HIGHEST                               # keep f32 accuracy on MXU

    sums = jnp.dot(g, S, preferred_element_type=jnp.float32, precision=hp)      # (TB, k)
    mean = sums * jnp.float32(1.0 / p)
    gc = g - jnp.dot(mean, St, preferred_element_type=jnp.float32, precision=hp)
    ss = jnp.dot(gc * gc, S, preferred_element_type=jnp.float32, precision=hp)  # (TB, k)
    inv = jnp.where(ss > 0.0, lax.rsqrt(ss), jnp.float32(1.0))
    inv = inv * jnp.float32(n_actions)
    inv_b = jnp.dot(inv, St, preferred_element_type=jnp.float32, precision=hp)  # (TB, L)
    out_ref[...] = (gc * inv_b).astype(out_ref.dtype)


# --------------------------------------------------------------------------- #
# Wrapper
# --------------------------------------------------------------------------- #
def _vmem_capacity_bytes() -> int:
    try:
        cap = getattr(pltpu.get_tpu_info(), "vmem_capacity_bytes", None)
        if cap:
            return int(cap)
    except Exception:
        pass
    return 64 << 20  # v7x per-TensorCore VMEM; safe lower bound for v5e/v6e too


def _choose_tb(R: int, L: int, buf_budget_bytes: int) -> int:
    """Rows per block: fill VMEM with multi-MiB blocks, keep >= 2 grid steps."""
    if R <= 8:
        return R
    tb_vmem = buf_budget_bytes // (16 * L)              # 2x in + 2x out f32 buffers
    tb_half = (R + 1) // 2                              # guarantee >= 2 steps (v7x)
    min_block_rows = max(8, (2 << 20) // (4 * L))       # keep blocks >= ~2 MiB
    tb_steps = max(min_block_rows, pl.cdiv(R, 8))       # ~8-deep pipeline when large
    tb = min(tb_vmem, tb_half, tb_steps)
    tb = max(8, (tb // 8) * 8)                          # sublane multiple
    return min(tb, R)


def normalize_forward(G, n_actions: int):
    """Pallas equivalent of Normalize.forward.  G: (B, C, n, n) -> same shape."""
    B, C, n1, n2 = G.shape
    assert n1 == n_actions and n2 == n_actions, "spatial dims must equal n_actions"
    p = n_actions * n_actions
    rows = B * C

    # Lane-dense repack: pack k matrices per row so 128-lane vregs are full.
    k = 1
    if p < 128:
        for cand in range(min(128 // p, rows), 0, -1):
            if rows % cand == 0:
                k = cand
                break
    L = k * p
    R = rows // k
    x = G.reshape(R, L)                                  # row-major, free

    vmem_cap = _vmem_capacity_bytes()
    vmem_limit = (vmem_cap // 4) * 3                     # 48 MiB v7x / 96 MiB v5e-v6e
    buf_budget = (vmem_limit * 2) // 3
    TB = _choose_tb(R, L, buf_budget)
    grid = (pl.cdiv(R, TB),)                             # ragged tail masked by Pallas

    cost = pl.CostEstimate(
        flops=8 * rows * p,
        transcendentals=rows,
        bytes_accessed=2 * rows * p * G.dtype.itemsize,
    )
    cparams = pltpu.CompilerParams(
        dimension_semantics=("parallel",),               # megacore on v7x; no-op v5e/v6e
        vmem_limit_bytes=vmem_limit,
    )
    out_shape = jax.ShapeDtypeStruct((R, L), G.dtype)
    row_spec = pl.BlockSpec((TB, L), lambda i: (i, 0))

    if k == 1:
        out = pl.pallas_call(
            functools.partial(_normalize_rowwise_kernel, n_actions=n_actions),
            out_shape=out_shape,
            grid_spec=pltpu.PrefetchScalarGridSpec(
                num_scalar_prefetch=0,
                grid=grid,
                in_specs=[row_spec],
                out_specs=row_spec,
            ),
            compiler_params=cparams,
            cost_estimate=cost,
        )(x)
    else:
        # Constant 0/1 segment matrices (tiny; constant index map -> DMA'd once).
        seg = jnp.arange(L, dtype=jnp.int32) // p
        kk = jnp.arange(k, dtype=jnp.int32)
        S = (seg[:, None] == kk[None, :]).astype(jnp.float32)     # (L, k)
        St = (kk[:, None] == seg[None, :]).astype(jnp.float32)    # (k, L)
        out = pl.pallas_call(
            functools.partial(_normalize_packed_kernel, n_actions=n_actions, p=p),
            out_shape=out_shape,
            grid_spec=pltpu.PrefetchScalarGridSpec(
                num_scalar_prefetch=0,
                grid=grid,
                in_specs=[
                    pl.BlockSpec((L, k), lambda i: (0, 0)),
                    pl.BlockSpec((k, L), lambda i: (0, 0)),
                    row_spec,
                ],
                out_specs=row_spec,
            ),
            compiler_params=cparams,
            cost_estimate=cost,
        )(S, St, x)

    return out.reshape(B, C, n_actions, n_actions)


def reference_forward(G, n_actions: int):
    """Pure-JAX reference mirroring the PyTorch Normalize module."""
    x = G.astype(jnp.float32)
    mean = jnp.mean(x, axis=(2, 3), keepdims=True)
    x = x - mean
    norm = jnp.sqrt(jnp.sum(x * x, axis=(2, 3), keepdims=True))
    norm = jnp.where(norm > 0.0, norm, 1.0)
    return (x / norm * n_actions).astype(G.dtype)


# --------------------------------------------------------------------------- #
# Self-test
# --------------------------------------------------------------------------- #
if __name__ == "__main__":
    root = jax.random.PRNGKey(0)
    k1, k2, k3 = jax.random.split(root, 3)

    # Case 1: small p (n=4, p=16) -> lane-dense packed MXU path, single block.
    n = 4
    G1 = jax.random.normal(k1, (2, 4, n, n), jnp.float32)
    G1 = G1.at[1, 2].set(0.0)                     # exercise the norm > 0 guard
    o1 = jax.block_until_ready(normalize_forward(G1, n))
    r1 = reference_forward(G1, n)
    assert o1.shape == G1.shape and o1.dtype == G1.dtype
    assert jnp.allclose(o1, r1, atol=1e-5, rtol=1e-5)
    assert jnp.all(o1[1, 2] == 0.0)               # zero matrix stays exactly zero
    assert jnp.allclose(jnp.mean(o1, axis=(2, 3)), 0.0, atol=1e-5)

    # Case 2: more rows -> packed path with a ragged grid tail (R=20, TB=8).
    G2 = jax.random.normal(k2, (4, 40, n, n), jnp.float32)
    G2 = G2.at[3, 39].set(0.0)
    o2 = jax.block_until_ready(normalize_forward(G2, n))
    r2 = reference_forward(G2, n)
    assert jnp.allclose(o2, r2, atol=1e-5, rtol=1e-5)
    assert jnp.all(o2[3, 39] == 0.0)

    # Case 3: p >= 128 (n=12, p=144) -> plain per-row reduction path.
    n3 = 12
    G3 = jax.random.normal(k3, (2, 3, n3, n3), jnp.float32)
    o3 = jax.block_until_ready(normalize_forward(G3, n3))
    r3 = reference_forward(G3, n3)
    assert jnp.allclose(o3, r3, atol=1e-5, rtol=1e-5)

    print("KERNEL_OK")
</pallas_src>

<mosaic_0001>
module attributes {stable_mosaic.version = 11 : i64} {
  func.func @_normalize_packed_kernel(%arg0: i32, %arg1: memref<128x8xf32, #tpu.memory_space<vmem>>, %arg2: memref<8x128xf32, #tpu.memory_space<vmem>>, %arg3: memref<1x128xf32, #tpu.memory_space<vmem>>, %arg4: memref<1x128xf32, #tpu.memory_space<vmem>>) attributes {dimension_semantics = [#tpu.dimension_semantics<parallel>], iteration_bounds = array<i64: 1>, scalar_prefetch = 0 : i64, scratch_operands = 0 : i64, tpu.core_type = #tpu.core_type<tc>, window_params = [{pipeline_mode = #tpu.pipeline_mode<synchronous>, transform_indices = @transform_0, window_bounds = array<i64: 128, 8>}, {pipeline_mode = #tpu.pipeline_mode<synchronous>, transform_indices = @transform_1, window_bounds = array<i64: 8, 128>}, {transform_indices = @transform_2, window_bounds = array<i64: 1, 128>}, {transform_indices = @transform_3, window_bounds = array<i64: 1, 128>}]} {
    %c0 = arith.constant 0 : index
    %c0_0 = arith.constant 0 : index
    %0 = vector.load %arg3[%c0, %c0_0] : memref<1x128xf32, #tpu.memory_space<vmem>>, vector<1x128xf32>
    %c0_1 = arith.constant 0 : index
    %c0_2 = arith.constant 0 : index
    %1 = vector.load %arg1[%c0_1, %c0_2] : memref<128x8xf32, #tpu.memory_space<vmem>>, vector<128x8xf32>
    %c0_3 = arith.constant 0 : index
    %c0_4 = arith.constant 0 : index
    %2 = vector.load %arg2[%c0_3, %c0_4] : memref<8x128xf32, #tpu.memory_space<vmem>>, vector<8x128xf32>
    %cst = arith.constant dense<0.000000e+00> : vector<1x8xf32>
    %3 = tpu.matmul %0, %1, %cst {dimension_numbers = #tpu.dot_dimension_numbers<[1], [0], [0], [1], [0, 0, 1, 1], [], []>, precision = #tpu.contract_precision<fp32>} : vector<1x128xf32>, vector<128x8xf32>, vector<1x8xf32> -> vector<1x8xf32>
    %cst_5 = arith.constant 6.250000e-02 : f32
    %4 = vector.broadcast %cst_5 : f32 to vector<1x8xf32>
    %5 = arith.mulf %3, %4 : vector<1x8xf32>
    %cst_6 = arith.constant dense<0.000000e+00> : vector<1x128xf32>
    %6 = tpu.matmul %5, %2, %cst_6 {dimension_numbers = #tpu.dot_dimension_numbers<[1], [0], [0], [1], [0, 0, 1, 1], [], []>, precision = #tpu.contract_precision<fp32>} : vector<1x8xf32>, vector<8x128xf32>, vector<1x128xf32> -> vector<1x128xf32>
    %7 = arith.subf %0, %6 : vector<1x128xf32>
    %8 = arith.mulf %7, %7 : vector<1x128xf32>
    %cst_7 = arith.constant dense<0.000000e+00> : vector<1x8xf32>
    %9 = tpu.matmul %8, %1, %cst_7 {dimension_numbers = #tpu.dot_dimension_numbers<[1], [0], [0], [1], [0, 0, 1, 1], [], []>, precision = #tpu.contract_precision<fp32>} : vector<1x128xf32>, vector<128x8xf32>, vector<1x8xf32> -> vector<1x8xf32>
    %cst_8 = arith.constant 0.000000e+00 : f32
    %10 = vector.broadcast %cst_8 : f32 to vector<1x8xf32>
    %11 = arith.cmpf ogt, %9, %10 : vector<1x8xf32>
    %12 = math.rsqrt %9 : vector<1x8xf32>
    %cst_9 = arith.constant 1.000000e+00 : f32
    %13 = vector.broadcast %cst_9 : f32 to vector<1x8xf32>
    %14 = arith.select %11, %12, %13 : vector<1x8xi1>, vector<1x8xf32>
    %cst_10 = arith.constant 4.000000e+00 : f32
    %15 = vector.broadcast %cst_10 : f32 to vector<1x8xf32>
    %16 = arith.mulf %14, %15 : vector<1x8xf32>
    %cst_11 = arith.constant dense<0.000000e+00> : vector<1x128xf32>
    %17 = tpu.matmul %16, %2, %cst_11 {dimension_numbers = #tpu.dot_dimension_numbers<[1], [0], [0], [1], [0, 0, 1, 1], [], []>, precision = #tpu.contract_precision<fp32>} : vector<1x8xf32>, vector<8x128xf32>, vector<1x128xf32> -> vector<1x128xf32>
    %18 = arith.mulf %7, %17 : vector<1x128xf32>
    %c0_12 = arith.constant 0 : index
    %c0_13 = arith.constant 0 : index
    %19 = vector.load %arg4[%c0_12, %c0_13] : memref<1x128xf32, #tpu.memory_space<vmem>>, vector<1x128xf32>
    tpu.vector_store %arg4[%c0_12, %c0_13], %18 {strides = array<i32>} : memref<1x128xf32, #tpu.memory_space<vmem>>, vector<1x128xf32>,
    return
  }
  func.func @transform_0(%arg0: i32) -> (i32, i32) {
    %c0_i32 = arith.constant 0 : i32
    %c0_i32_0 = arith.constant 0 : i32
    %c0_i32_1 = arith.constant 0 : i32
    return %c0_i32, %c0_i32_0 : i32, i32
  }
  func.func @transform_1(%arg0: i32) -> (i32, i32) {
    %c0_i32 = arith.constant 0 : i32
    %c0_i32_0 = arith.constant 0 : i32
    %c0_i32_1 = arith.constant 0 : i32
    return %c0_i32, %c0_i32_0 : i32, i32
  }
  func.func @transform_2(%arg0: i32) -> (i32, i32) {
    %c0_i32 = arith.constant 0 : i32
    %c0_i32_0 = arith.constant 0 : i32
    return %arg0, %c0_i32 : i32, i32
  }
  func.func @transform_3(%arg0: i32) -> (i32, i32) {
    %c0_i32 = arith.constant 0 : i32
    %c0_i32_0 = arith.constant 0 : i32
    return %arg0, %c0_i32 : i32, i32
  }
}

</mosaic_0001>

<bundles_post_ra>
// kernel: tpu_custom_call.1
= control target key start
LH: loop header
LB: loop body
LE: loop exit
PB: predicated region body
PF: predicated region fallthrough
CT: control target
= control target key end

     0   :  { %v3303_v3 = vmov 0.0|0.0   ;;  %vm3304_vm0 = vmmov 0   ;;  %v3305_v8 = vmov 0.0   ;;  %s3846_s0 = inlined_call_operand.vmem [shape: f32[128,8], index: 0, kind: input, shape index: {}]   ;;  %s3847_s1 = inlined_call_operand.vmem [shape: f32[8,128], index: 1, kind: input, shape index: {}]   ;;  %s3848_s2 = inlined_call_operand.vmem [shape: f32[1,128], index: 2, kind: input, shape index: {}]   ;;  %s3849_s3 = inlined_call_operand.hbm [shape: f32[1,128], index: 3, kind: output, shape index: {}]  }
   0x1   :  { %v16_v0 = vld [vmem:[%s3846_s0] sm:$0xff]  ;;  %v17_v1 = vld [vmem:[%s3846_s0 + $0x8] sm:$0xff]  ;;  %v18_v2 = vld [vmem:[%s3846_s0 + $0x10] sm:$0xff]  ;;  %2945 = vmatprep.subr.bf16.mxu0 %v3303_v3  ;;  %2497 = vmatprep.mubr.msk.f32.mxu0 %vm3304_vm0, %v3305_v8 }
   0x2   :  { %v34_v4 = vand.u32 4294901760, %v16_v0  ;;  %v37_v5 = vand.u32 4294901760, %v17_v1  ;;  %v19_v6 = vld [vmem:[%s3846_s0 + $0x18] sm:$0xff]  ;;  %v40_v7 = vand.u32 4294901760, %v18_v2  ;;  %v20_v10 = vld [vmem:[%s3846_s0 + $0x20] sm:$0xff]  ;;  %v21_v11 = vld [vmem:[%s3846_s0 + $0x28] sm:$0xff]  ;;  %2675 = vmatprep.subr.mxu1 %v3305_v8  ;;  %2677 = vmatprep.mubr.msk.f32.mxu1 %vm3304_vm0, %v3305_v8 }
   0x3   :  { %v43_v9 = vand.u32 4294901760, %v19_v6  ;;  %v46_v14 = vand.u32 4294901760, %v20_v10  ;;  %v49_v15 = vand.u32 4294901760, %v21_v11  ;;  %v22_v16 = vld [vmem:[%s3846_s0 + $0x30] sm:$0xff]  ;;  %v23_v17 = vld [vmem:[%s3846_s0 + $0x38] sm:$0xff] }
   0x4   :  { %v3351_v12 = vpack.c.bf16 %v37_v5, %v34_v4 }
   0x5   :  { %v3354_v13 = vpack.c.bf16 %v43_v9, %v40_v7 }
   0x6   :  { %2947 = vmatpush3.bf16.msra.mxu0 %v3351_v12 }
   0x7   :  { %2948 = vmatprep.subr.bf16.mxu0 %v3303_v3 }
   0x8   :  { %8 = vsyncpa [#allocation3], 0  ;;  %v3364_v18 = vpack.c.bf16 %v49_v15, %v46_v14  ;;  %v52_v19 = vand.u32 4294901760, %v22_v16  ;;  %v55_v20 = vand.u32 4294901760, %v23_v17  ;;  %v24_v21 = vld [vmem:[%s3846_s0 + $0x40] sm:$0xff]  ;;  %v25_v23 = vld [vmem:[%s3846_s0 + $0x48] sm:$0xff]  ;;  %v3402_v34 = vsub.f32 %v16_v0, %v34_v4 }
   0x9   :  { %v3372_v22 = vld [vmem:[%s3848_s2] sm:$0x1]  ;;  %v26_v24 = vld [vmem:[%s3846_s0 + $0x50] sm:$0xff]  ;;  %v27_v25 = vld [vmem:[%s3846_s0 + $0x58] sm:$0xff]  ;;  %v58_v27 = vand.u32 4294901760, %v24_v21  ;;  %v61_v33 = vand.u32 4294901760, %v25_v23  ;;  %v3404_v35 = vsub.f32 %v17_v1, %v37_v5  ;;  %v3411_v43 = vsub.f32 %v18_v2, %v40_v7 }
   0xa   :  { %2950 = vmatpush3.bf16.msra.mxu0 %v3354_v13  ;;  %v28_v26 = vld [vmem:[%s3846_s0 + $0x60] sm:$0xff]  ;;  %v29_v28 = vld [vmem:[%s3846_s0 + $0x68] sm:$0xff]  ;;  %v30_v29 = vld [vmem:[%s3846_s0 + $0x70] sm:$0xff]  ;;  %v3397_v31 = vand.u32 4294901760, %v3372_v22  ;;  %v3400_v32 = vpack.c.bf16 %v55_v20, %v52_v19  ;;  %v64_v36 = vand.u32 4294901760, %v26_v24  ;;  %v67_v37 = vand.u32 4294901760, %v27_v25 }
   0xb   :  { %2951 = vmatprep.subr.bf16.mxu0 %v3303_v3  ;;  %v31_v30 = vld [vmem:[%s3846_s0 + $0x78] sm:$0xff]  ;;  %v70_v38 = vand.u32 4294901760, %v28_v26  ;;  %v73_v39 = vand.u32 4294901760, %v29_v28  ;;  %v76_v40 = vand.u32 4294901760, %v30_v29  ;;  %v3413_v44 = vsub.f32 %v19_v6, %v43_v9 }
   0xc   :  { %v79_v41 = vand.u32 4294901760, %v31_v30  ;;  %v3409_v42 = vsub.f32 %v3372_v22, %v3397_v31  ;;  %v3416_v45 = vpack.c.bf16 %v61_v33, %v58_v27  ;;  %v127_v46 = vand.u32 4294901760, %v3402_v34 }
   0xd   :  { %v134_v47 = vand.u32 4294901760, %v3404_v35  ;;  %v3420_v48 = vsub.f32 %v20_v10, %v46_v14  ;;  %v3423_v49 = vpack.c.bf16 %v67_v37, %v64_v36  ;;  %v3425_v50 = vpack.c.bf16 %v73_v39, %v70_v38 }
   0xe   :  { %2953 = vmatpush3.bf16.msra.mxu0 %v3364_v18  ;;  %v3427_v51 = vpack.c.bf16 %v79_v41, %v76_v40  ;;  %v116_v52 = vand.u32 4294901760, %v3409_v42  ;;  %v141_v53 = vand.u32 4294901760, %v3411_v43  ;;  %v148_v54 = vand.u32 4294901760, %v3413_v44 }
   0xf   :  { %2954 = vmatprep.subr.bf16.mxu0 %v3303_v3  ;;  %v3432_v55 = vsub.f32 %v21_v11, %v49_v15  ;;  %v128_v56 = vsub.f32 %v3402_v34, %v127_v46  ;;  %v135_v57 = vsub.f32 %v3404_v35, %v134_v47  ;;  %v155_v58 = vand.u32 4294901760, %v3420_v48 }
  0x10   :  { %v3438_v59 = vsub.f32 %v22_v16, %v52_v19  ;;  %v3441_v60 = vsub.f32 %v23_v17, %v55_v20  ;;  %v3443_v61 = vsub.f32 %v24_v21, %v58_v27  ;;  %v3445_v62 = vsub.f32 %v25_v23, %v61_v33 }
  0x11   :  { %v3447_v63 = vsub.f32 %v26_v24, %v64_v36  ;;  %v3449_v0 = vsub.f32 %v27_v25, %v67_v37  ;;  %v3451_v1 = vsub.f32 %v28_v26, %v70_v38  ;;  %v3453_v2 = vsub.f32 %v29_v28, %v73_v39 }
  0x12   :  { %2956 = vmatpush3.bf16.msra.mxu0 %v3400_v32  ;;  %v3455_v4 = vsub.f32 %v30_v29, %v76_v40  ;;  %v117_v5 = vsub.f32 %v3409_v42, %v116_v52  ;;  %v142_v6 = vsub.f32 %v3411_v43, %v141_v53  ;;  %v162_v7 = vand.u32 4294901760, %v3432_v55 }
  0x13   :  { %2957 = vmatprep.subr.bf16.mxu0 %v3303_v3  ;;  %v3462_v9 = vsub.f32 %v31_v30, %v79_v41  ;;  %v129_v10 = vand.u32 4294901760, %v128_v56  ;;  %v136_v11 = vand.u32 4294901760, %v135_v57  ;;  %v149_v14 = vsub.f32 %v3413_v44, %v148_v54 }
  0x14   :  { %v169_v15 = vand.u32 4294901760, %v3438_v59  ;;  %v176_v16 = vand.u32 4294901760, %v3441_v60  ;;  %v183_v17 = vand.u32 4294901760, %v3443_v61  ;;  %v190_v19 = vand.u32 4294901760, %v3445_v62 }
  0x15   :  { %v197_v20 = vand.u32 4294901760, %v3447_v63  ;;  %v204_v21 = vand.u32 4294901760, %v3449_v0  ;;  %v211_v23 = vand.u32 4294901760, %v3451_v1  ;;  %v218_v24 = vand.u32 4294901760, %v3453_v2 }
  0x16   :  { %2959 = vmatpush3.bf16.msra.mxu0 %v3416_v45  ;;  %v225_v25 = vand.u32 4294901760, %v3455_v4  ;;  %v232_v26 = vand.u32 4294901760, %v3462_v9  ;;  %v3477_v27 = vpack.c.bf16 %v134_v47, %v127_v46  ;;  %v3479_v28 = vpack.c.bf16 %v148_v54, %v141_v53 }
  0x17   :  { %2960 = vmatprep.subr.bf16.mxu0 %v3303_v3  ;;  %v3481_v29 = vpack.c.bf16 %v162_v7, %v155_v58  ;;  %v3484_v30 = vpack.c.bf16 %v176_v16, %v169_v15  ;;  %v3486_v33 = vpack.c.bf16 %v190_v19, %v183_v17  ;;  %v3488_v36 = vpack.c.bf16 %v204_v21, %v197_v20 }
  0x18   :  { %v3490_v37 = vpack.c.bf16 %v218_v24, %v211_v23  ;;  %v3493_v38 = vpack.c.bf16 %v232_v26, %v225_v25  ;;  %v118_v39 = vand.u32 4294901760, %v117_v5  ;;  %v156_v40 = vsub.f32 %v3420_v48, %v155_v58 }
  0x19   :  { %v3497_v41 = vpack.c.bf16 %v136_v11, %v129_v10  ;;  %v143_v46 = vand.u32 4294901760, %v142_v6  ;;  %v150_v47 = vand.u32 4294901760, %v149_v14  ;;  %v163_v53 = vsub.f32 %v3432_v55, %v162_v7 }
  0x1a   :  { %2962 = vmatpush3.bf16.msra.mxu0 %v3423_v49  ;;  %v170_v54 = vsub.f32 %v3438_v59, %v169_v15  ;;  %v157_v57 = vand.u32 4294901760, %v156_v40  ;;  %v177_v58 = vsub.f32 %v3441_v60, %v176_v16  ;;  %v184_v11 = vsub.f32 %v3443_v61, %v183_v17 }
  0x1b   :  { %2963 = vmatprep.subr.bf16.mxu0 %v3303_v3  ;;  %v3503_v56 = vpack.c.bf16 %v150_v47, %v143_v46  ;;  %v164_v5 = vand.u32 4294901760, %v163_v53  ;;  %v191_v14 = vsub.f32 %v3445_v62, %v190_v19  ;;  %v198_v15 = vsub.f32 %v3447_v63, %v197_v20 }
  0x1c   :  { %v171_v6 = vand.u32 4294901760, %v170_v54  ;;  %v178_v10 = vand.u32 4294901760, %v177_v58  ;;  %v205_v46 = vsub.f32 %v3449_v0, %v204_v21  ;;  %v212_v47 = vsub.f32 %v3451_v1, %v211_v23 }
  0x1d   :  { %v3510_v7 = vpack.c.bf16 %v164_v5, %v157_v57  ;;  %v192_v40 = vand.u32 4294901760, %v191_v14  ;;  %v199_v19 = vand.u32 4294901760, %v198_v15  ;;  %v219_v20 = vsub.f32 %v3453_v2, %v218_v24 }
  0x1e   :  { %2965 = vmatpush3.bf16.msra.mxu0 %v3425_v50  ;;  %v3517_v16 = vpack.c.bf16 %v178_v10, %v171_v6  ;;  %v206_v53 = vand.u32 4294901760, %v205_v46  ;;  %v226_v54 = vsub.f32 %v3455_v4, %v225_v25  ;;  %v213_v21 = vand.u32 4294901760, %v212_v47 }
  0x1f   :  { %2966 = vmatprep.subr.bf16.mxu0 %v3303_v3  ;;  %v220_v5 = vand.u32 4294901760, %v219_v20  ;;  %v233_v23 = vsub.f32 %v3462_v9, %v232_v26  ;;  %v3544_v26 = vpack.c.bf16 %v3404_v35, %v3402_v34  ;;  %v3551_v10 = vpack.c.bf16 %v3413_v44, %v3411_v43 }
  0x20   :  { %v3529_v57 = vpack.c.bf16 %v206_v53, %v199_v19  ;;  %v227_v6 = vand.u32 4294901760, %v226_v54  ;;  %v3559_v34 = vpack.c.bf16 %v3432_v55, %v3420_v48  ;;  %v3565_v35 = vpack.c.bf16 %v3441_v60, %v3438_v59 }
  0x21   :  { %v3534_v58 = vpack.c.bf16 %v220_v5, %v213_v21  ;;  %v234_v24 = vand.u32 4294901760, %v233_v23  ;;  %v3571_v43 = vpack.c.bf16 %v3445_v62, %v3443_v61  ;;  %v3577_v44 = vpack.c.bf16 %v3449_v0, %v3447_v63 }
  0x22   :  { %2968 = vmatpush3.bf16.msra.mxu0 %v3427_v51  ;;  %v3583_v48 = vpack.c.bf16 %v3453_v2, %v3451_v1  ;;  %v3589_v55 = vpack.c.bf16 %v3462_v9, %v3455_v4  ;;  %vm675_vm1 = vcmask 64512  }
  0x23   :  { %2969 = vmatprep.subr.bf16.mxu0 %v3303_v3  ;;  %v3538_v25 = vpack.c.bf16 %v234_v24, %v227_v6 }
  0x25   :  { %2498 = vmatmul.mubr.f32.vlgmr.msra.gmra.mrb[0].mxu0 %v118_v39  ;;  %v185_v39 = vand.u32 4294901760, %v184_v11 }
  0x26   :  { %2971 = vmatpush3.bf16.msra.mxu0 %v3497_v41  ;;  %2532 = vmatprep.mubr.msk.f32.mxu0 %vm3304_vm0, %v3305_v8 }
  0x27   :  { %2972 = vmatprep.subr.bf16.mxu0 %v3303_v3  ;;  %v3523_v17 = vpack.c.bf16 %v192_v40, %v185_v39 }
  0x2a   :  { %2974 = vmatpush3.bf16.msra.mxu0 %v3503_v56 }
  0x2b   :  { %2975 = vmatprep.subr.bf16.mxu0 %v3303_v3 }
  0x2e   :  { %2977 = vmatpush3.bf16.msra.mxu0 %v3510_v7 }
  0x2f   :  { %2978 = vmatprep.subr.bf16.mxu0 %v3303_v3 }
  0x32   :  { %2980 = vmatpush3.bf16.msra.mxu0 %v3517_v16 }
  0x33   :  { %2981 = vmatprep.subr.bf16.mxu0 %v3303_v3 }
  0x36   :  { %2983 = vmatpush3.bf16.msra.mxu0 %v3523_v17 }
  0x37   :  { %2984 = vmatprep.subr.bf16.mxu0 %v3303_v3 }
  0x3a   :  { %2986 = vmatpush3.bf16.msra.mxu0 %v3529_v57 }
  0x3b   :  { %2987 = vmatprep.subr.bf16.mxu0 %v3303_v3 }
  0x3e   :  { %2989 = vmatpush3.bf16.msra.mxu0 %v3534_v58 }
  0x3f   :  { %2990 = vmatprep.subr.bf16.mxu0 %v3303_v3 }
  0x42   :  { %2992 = vmatpush3.bf16.msra.mxu0 %v3538_v25 }
  0x43   :  { %2993 = vmatprep.subr.bf16.mxu0 %v3303_v3 }
  0x45   :  { %2533 = vmatmul.mubr.f32.vlgmr.msra.gmra.mrb[0].mxu0 %v3397_v31 }
  0x46   :  { %2995 = vmatpush3.bf16.msra.mxu0 %v3544_v26  ;;  %2567 = vmatprep.mubr.msk.f32.mxu0 %vm3304_vm0, %v3305_v8 }
  0x47   :  { %2996 = vmatprep.subr.bf16.mxu0 %v3303_v3 }
  0x4a   :  { %2998 = vmatpush3.bf16.msra.mxu0 %v3551_v10 }
  0x4b   :  { %2999 = vmatprep.subr.bf16.mxu0 %v3303_v3 }
  0x4e   :  { %3001 = vmatpush3.bf16.msra.mxu0 %v3559_v34 }
  0x4f   :  { %3002 = vmatprep.subr.bf16.mxu0 %v3303_v3 }
  0x52   :  { %3004 = vmatpush3.bf16.msra.mxu0 %v3565_v35 }
  0x53   :  { %3005 = vmatprep.subr.bf16.mxu0 %v3303_v3 }
  0x56   :  { %3007 = vmatpush3.bf16.msra.mxu0 %v3571_v43 }
  0x57   :  { %3008 = vmatprep.subr.bf16.mxu0 %v3303_v3 }
  0x5a   :  { %3010 = vmatpush3.bf16.msra.mxu0 %v3577_v44 }
  0x5b   :  { %3011 = vmatprep.subr.bf16.mxu0 %v3303_v3 }
  0x5e   :  { %3013 = vmatpush3.bf16.msra.mxu0 %v3583_v48 }
  0x5f   :  { %3014 = vmatprep.subr.bf16.mxu0 %v3303_v3 }
  0x62   :  { %3016 = vmatpush3.bf16.msra.mxu0 %v3589_v55 }
  0x63   :  { %3017 = vmatprep.subr.bf16.mxu0 %v3303_v3 }
  0x65   :  { %2568 = vmatmul.mubr.f32.vlgmr.msra.gmra.mrb[0].mxu0 %v3409_v42  ;;  %v32_v42 = vld [vmem:[%s3847_s1] sm:$0xff]  ;;  %s3306_s1 = smov [#allocation2]  }
  0x66   :  { %3019 = vmatpush3.bf16.msra.mxu0 %v3351_v12  ;;  %2602 = vmatprep.mubr.msk.f32.mxu0 %vm3304_vm0, %v3305_v8  ;;  %s2229_s19 = sshll.u32 %s3306_s1, 4  ;;  %s2230_s19 = int_to_ptr.vmem [resolvable:$true] %s2229_s19 }
  0x67   :  { %3020 = vmatprep.subr.bf16.mxu0 %v3303_v3  ;;  %s3279_s20 = scalar_lea.vmem %s2230_s19, 16  ;;  %s3283_s21 = scalar_lea.vmem %s2230_s19, 32 }
  0x68   :  { %p3280_p0 = scmp.ne.s32.totalorder %s2230_s19, %s3279_s20  ;;  %p3284_p1 = scmp.lt.s32.totalorder %s2230_s19, %s2230_s19 }
  0x69   :  { %p3285_p2 = scmp.lt.s32.totalorder %s3283_s21, %s3279_s20 }
  0x6a   :  { %3022 = vmatpush3.bf16.msra.mxu0 %v3354_v13 }
  0x6b   :  { %3023 = vmatprep.subr.bf16.mxu0 %v3303_v3  ;;  %p3286_p3 = por %p3285_p2, %p3284_p1 }
  0x6d   :  { %p3287_p4 = pnand %p3286_p3, %p3280_p0 }
  0x6e   :  { %3025 = vmatpush3.bf16.msra.mxu0 %v3364_v18 }
  0x6f   :  { %3026 = vmatprep.subr.bf16.mxu0 %v3303_v3 }
  0x72   :  { %3028 = vmatpush3.bf16.msra.mxu0 %v3400_v32 }
  0x73   :  { %3029 = vmatprep.subr.bf16.mxu0 %v3303_v3 }
  0x76   :  { %3031 = vmatpush3.bf16.msra.mxu0 %v3416_v45 }
  0x77   :  { %3032 = vmatprep.subr.bf16.mxu0 %v3303_v3 }
  0x7a   :  { %3034 = vmatpush3.bf16.msra.mxu0 %v3423_v49 }
  0x7b   :  { %3035 = vmatprep.subr.bf16.mxu0 %v3303_v3 }
  0x7e   :  { %3037 = vmatpush3.bf16.msra.mxu0 %v3425_v50 }
  0x7f   :  { %3038 = vmatprep.subr.bf16.mxu0 %v3303_v3 }
  0x82   :  { %3040 = vmatpush3.bf16.msra.mxu0 %v3427_v51 }
  0x83   :  { %3041 = vmatprep.subr.bf16.mxu0 %v3303_v3 }
  0x85   :  { %2603 = vmatmul.mubr.f32.vlgmr.msra.gmra.mrb[0].mxu0 %v116_v52  ;;  %v3658_v52 = vand.u32 4294901760, %v32_v42 }
  0x86   :  { %3043 = vmatpush3.bf16.msra.mxu0 %v3477_v27  ;;  %2637 = vmatprep.mubr.msk.f32.mxu0 %vm3304_vm0, %v3305_v8 }
  0x87   :  { %3044 = vmatprep.subr.bf16.mxu0 %v3303_v3  ;;  %2676 = vmatpush3.msra.mxu1 %v3658_v52  ;;  %v3665_v59 = vsub.f32 %v32_v42, %v3658_v52 }
  0x88   :  { %2680 = vmatprep.subr.mxu1 %v3305_v8 }
  0x89   :  { %v3669_v63 = vand.u32 4294901760, %v3665_v59 }
  0x8a   :  { %3046 = vmatpush3.bf16.msra.mxu0 %v3479_v28 }
  0x8b   :  { %3047 = vmatprep.subr.bf16.mxu0 %v3303_v3  ;;  %v759_v2 = vsub.f32 %v3665_v59, %v3669_v63 }
  0x8d   :  { %v3673_v11 = vand.u32 4294901760, %v759_v2 }
  0x8e   :  { %3049 = vmatpush3.bf16.msra.mxu0 %v3481_v29 }
  0x8f   :  { %3050 = vmatprep.subr.bf16.mxu0 %v3303_v3 }
  0x92   :  { %3052 = vmatpush3.bf16.msra.mxu0 %v3484_v30 }
  0x93   :  { %3053 = vmatprep.subr.bf16.mxu0 %v3303_v3 }
  0x96   :  { %3055 = vmatpush3.bf16.msra.mxu0 %v3486_v33 }
  0x97   :  { %3056 = vmatprep.subr.bf16.mxu0 %v3303_v3 }
  0x9a   :  { %3058 = vmatpush3.bf16.msra.mxu0 %v3488_v36 }
  0x9b   :  { %3059 = vmatprep.subr.bf16.mxu0 %v3303_v3 }
  0x9e   :  { %3061 = vmatpush3.bf16.msra.mxu0 %v3490_v37 }
  0x9f   :  { %3062 = vmatprep.subr.bf16.mxu0 %v3303_v3 }
  0xa2   :  { %3064 = vmatpush3.bf16.msra.mxu0 %v3493_v38 }
  0xa3   :  { %3065 = vmatprep.subr.bf16.mxu0 %v3303_v3 }
  0xa5   :  { %2638 = vmatmul.mubr.f32.vlgmr.msra.gmra.mrb[0].mxu0 %v3397_v31 }
  0xa6   :  { %3067 = vmatpush3.bf16.msra.mxu0 %v3351_v12  ;;  %2672 = vmatprep.mubr.msk.f32.mxu0 %vm3304_vm0, %v3305_v8 }
  0xa7   :  { %3068 = vmatprep.subr.bf16.mxu0 %v3303_v3 }
  0xaa   :  { %3070 = vmatpush3.bf16.msra.mxu0 %v3354_v13 }
  0xab   :  { %3071 = vmatprep.subr.bf16.mxu0 %v3303_v3 }
  0xae   :  { %3073 = vmatpush3.bf16.msra.mxu0 %v3364_v18 }
  0xaf   :  { %3074 = vmatprep.subr.bf16.mxu0 %v3303_v3 }
  0xb2   :  { %3076 = vmatpush3.bf16.msra.mxu0 %v3400_v32 }
  0xb3   :  { %3077 = vmatprep.subr.bf16.mxu0 %v3303_v3 }
  0xb6   :  { %3079 = vmatpush3.bf16.msra.mxu0 %v3416_v45 }
  0xb7   :  { %3080 = vmatprep.subr.bf16.mxu0 %v3303_v3 }
  0xba   :  { %3082 = vmatpush3.bf16.msra.mxu0 %v3423_v49 }
  0xbb   :  { %3083 = vmatprep.subr.bf16.mxu0 %v3303_v3 }
  0xbe   :  { %3085 = vmatpush3.bf16.msra.mxu0 %v3425_v50 }
  0xbf   :  { %3086 = vmatprep.subr.bf16.mxu0 %v3303_v3 }
  0xc2   :  { %3088 = vmatpush3.bf16.msra.mxu0 %v3427_v51 }
  0xc3   :  { %2915 = vmatprep.subr.mxu0 %v3305_v8 }
  0xc5   :  { %2673 = vmatmul.mubr.f32.vlgmr.msra.gmra.mrb[0].mxu0 %v3397_v31 }
  0xc6   :  { %2917 = vmatprep.mubr.msk.f32.mxu0 %vm3304_vm0, %v3305_v8  ;;  %2916 = vmatpush3.msra.mxu0 %v3658_v52 }
  0xc7   :  { %2920 = vmatprep.subr.mxu0 %v3305_v8 }
 0x198   :  { %v670_v31 = vpop.f32.mrb[0].mxu0 }
 0x199   :  { %v674_v60 = vmul.f32 0.0625, %v670_v31  ;;  %v2674_v61 = vpop.f32.mrb[1].mxu0 }
 0x19b   :  { %v677_v62 = vsel %vm675_vm1, %v674_v60, 0 }
 0x19c   :  { %v745_v0 = vand.u32 4294901760, %v677_v62 }
 0x19e   :  { %v746_v1 = vsub.f32 %v677_v62, %v745_v0 }
 0x1a0   :  { %v747_v4 = vand.u32 4294901760, %v746_v1 }
 0x1a2   :  { %v748_v9 = vsub.f32 %v746_v1, %v747_v4 }
 0x1a4   :  { %v749_v14 = vand.u32 4294901760, %v748_v9 }
 0x1a6   :  { %2678 = vmatmul.mubr.f32.vlgmr.msra.gmra.mrb[0].mxu1 %v749_v14 }
 0x1a7   :  { %2681 = vmatpush3.msra.mxu1 %v3673_v11  ;;  %2682 = vmatprep.mubr.msk.f32.mxu1 %vm3304_vm0, %v3305_v8 }
 0x1a8   :  { %2685 = vmatprep.subr.mxu1 %v3305_v8 }
 0x1ae   :  { %2683 = vmatmul.mubr.f32.vlgmr.msra.gmra.mrb[0].mxu1 %v745_v0 }
 0x1af   :  { %2686 = vmatpush3.msra.mxu1 %v3665_v59  ;;  %2687 = vmatprep.mubr.msk.f32.mxu1 %vm3304_vm0, %v3305_v8 }
 0x1b0   :  { %2690 = vmatprep.subr.mxu1 %v3305_v8 }
 0x1b6   :  { %2688 = vmatmul.mubr.f32.vlgmr.msra.gmra.mrb[0].mxu1 %v746_v1 }
 0x1b7   :  { %2691 = vmatpush3.msra.mxu1 %v3658_v52  ;;  %2692 = vmatprep.mubr.msk.f32.mxu1 %vm3304_vm0, %v3305_v8 }
 0x1b8   :  { %2695 = vmatprep.subr.mxu1 %v3305_v8 }
 0x1be   :  { %2693 = vmatmul.mubr.f32.vlgmr.msra.gmra.mrb[0].mxu1 %v747_v4 }
 0x1bf   :  { %2696 = vmatpush3.msra.mxu1 %v3669_v63  ;;  %2697 = vmatprep.mubr.msk.f32.mxu1 %vm3304_vm0, %v3305_v8 }
 0x1c0   :  { %2700 = vmatprep.subr.mxu1 %v3305_v8 }
 0x1c6   :  { %2698 = vmatmul.mubr.f32.vlgmr.msra.gmra.mrb[0].mxu1 %v745_v0 }
 0x1c7   :  { %2701 = vmatpush3.msra.mxu1 %v3658_v52  ;;  %2702 = vmatprep.mubr.msk.f32.mxu1 %vm3304_vm0, %v3305_v8 }
 0x1c8   :  { %3089 = vmatprep.subr.bf16.mxu1 %v3303_v3 }
 0x1ce   :  { %2703 = vmatmul.mubr.f32.vlgmr.msra.gmra.mrb[0].mxu1 %v745_v0 }
 0x1cf   :  { %3091 = vmatpush3.bf16.msra.mxu1 %v3351_v12  ;;  %2737 = vmatprep.mubr.msk.f32.mxu1 %vm3304_vm0, %v3305_v8 }
 0x1d0   :  { %3092 = vmatprep.subr.bf16.mxu1 %v3303_v3 }
 0x1d3   :  { %3094 = vmatpush3.bf16.msra.mxu1 %v3354_v13 }
 0x1d4   :  { %3095 = vmatprep.subr.bf16.mxu1 %v3303_v3 }
 0x1d7   :  { %3097 = vmatpush3.bf16.msra.mxu1 %v3364_v18 }
 0x1d8   :  { %3098 = vmatprep.subr.bf16.mxu1 %v3303_v3 }
 0x1db   :  { %3100 = vmatpush3.bf16.msra.mxu1 %v3400_v32 }
 0x1dc   :  { %3101 = vmatprep.subr.bf16.mxu1 %v3303_v3 }
 0x1df   :  { %3103 = vmatpush3.bf16.msra.mxu1 %v3416_v45 }
 0x1e0   :  { %3104 = vmatprep.subr.bf16.mxu1 %v3303_v3 }
 0x1e3   :  { %3106 = vmatpush3.bf16.msra.mxu1 %v3423_v49 }
 0x1e4   :  { %3107 = vmatprep.subr.bf16.mxu1 %v3303_v3 }
 0x1e7   :  { %3109 = vmatpush3.bf16.msra.mxu1 %v3425_v50 }
 0x1e8   :  { %3110 = vmatprep.subr.bf16.mxu1 %v3303_v3 }
 0x1eb   :  { %3112 = vmatpush3.bf16.msra.mxu1 %v3427_v51 }
 0x1ec   :  { %3113 = vmatprep.subr.bf16.mxu1 %v3303_v3 }
 0x2a1   :  { %v1121_v15 = vpop.f32.mrb[0].mxu1 }
 0x2a2   :  { %v3714_v39 = vsub.f32 %v3372_v22, %v1121_v15  ;;  %v2704_v40 = vpop.f32.mrb[1].mxu1 }
 0x2a4   :  { %v1126_v46 = vmul.f32 %v3714_v39, %v3714_v39 }
 0x2a6   :  { %v3718_v47 = vand.u32 4294901760, %v1126_v46 }
 0x2a8   :  { %v1209_v19 = vsub.f32 %v1126_v46, %v3718_v47 }
 0x2aa   :  { %v1210_v53 = vand.u32 4294901760, %v1209_v19 }
 0x2ac   :  { %v1211_v20 = vsub.f32 %v1209_v19, %v1210_v53 }
 0x2ae   :  { %v1212_v54 = vand.u32 4294901760, %v1211_v20 }
 0x2b0   :  { %2738 = vmatmul.mubr.f32.vlgmr.msra.gmra.mrb[2].mxu1 %v1212_v54 }
 0x2b1   :  { %3115 = vmatpush3.bf16.msra.mxu1 %v3497_v41  ;;  %2772 = vmatprep.mubr.msk.f32.mxu1 %vm3304_vm0, %v3305_v8 }
 0x2b2   :  { %3116 = vmatprep.subr.bf16.mxu1 %v3303_v3 }
 0x2b5   :  { %3118 = vmatpush3.bf16.msra.mxu1 %v3503_v56 }
 0x2b6   :  { %3119 = vmatprep.subr.bf16.mxu1 %v3303_v3 }
 0x2b9   :  { %3121 = vmatpush3.bf16.msra.mxu1 %v3510_v7 }
 0x2ba   :  { %3122 = vmatprep.subr.bf16.mxu1 %v3303_v3 }
 0x2bd   :  { %3124 = vmatpush3.bf16.msra.mxu1 %v3517_v16 }
 0x2be   :  { %3125 = vmatprep.subr.bf16.mxu1 %v3303_v3 }
 0x2c1   :  { %3127 = vmatpush3.bf16.msra.mxu1 %v3523_v17 }
 0x2c2   :  { %3128 = vmatprep.subr.bf16.mxu1 %v3303_v3 }
 0x2c5   :  { %3130 = vmatpush3.bf16.msra.mxu1 %v3529_v57 }
 0x2c6   :  { %3131 = vmatprep.subr.bf16.mxu1 %v3303_v3 }
 0x2c9   :  { %3133 = vmatpush3.bf16.msra.mxu1 %v3534_v58 }
 0x2ca   :  { %3134 = vmatprep.subr.bf16.mxu1 %v3303_v3 }
 0x2cd   :  { %3136 = vmatpush3.bf16.msra.mxu1 %v3538_v25 }
 0x2ce   :  { %3137 = vmatprep.subr.bf16.mxu1 %v3303_v3 }
 0x2d0   :  { %2773 = vmatmul.mubr.f32.vlgmr.msra.gmra.mrb[2].mxu1 %v3718_v47 }
 0x2d1   :  { %3139 = vmatpush3.bf16.msra.mxu1 %v3544_v26  ;;  %2807 = vmatprep.mubr.msk.f32.mxu1 %vm3304_vm0, %v3305_v8 }
 0x2d2   :  { %3140 = vmatprep.subr.bf16.mxu1 %v3303_v3 }
 0x2d5   :  { %3142 = vmatpush3.bf16.msra.mxu1 %v3551_v10 }
 0x2d6   :  { %3143 = vmatprep.subr.bf16.mxu1 %v3303_v3 }
 0x2d9   :  { %3145 = vmatpush3.bf16.msra.mxu1 %v3559_v34 }
 0x2da   :  { %3146 = vmatprep.subr.bf16.mxu1 %v3303_v3 }
 0x2dd   :  { %3148 = vmatpush3.bf16.msra.mxu1 %v3565_v35 }
 0x2de   :  { %3149 = vmatprep.subr.bf16.mxu1 %v3303_v3 }
 0x2e1   :  { %3151 = vmatpush3.bf16.msra.mxu1 %v3571_v43 }
 0x2e2   :  { %3152 = vmatprep.subr.bf16.mxu1 %v3303_v3 }
 0x2e5   :  { %3154 = vmatpush3.bf16.msra.mxu1 %v3577_v44 }
 0x2e6   :  { %3155 = vmatprep.subr.bf16.mxu1 %v3303_v3 }
 0x2e9   :  { %3157 = vmatpush3.bf16.msra.mxu1 %v3583_v48 }
 0x2ea   :  { %3158 = vmatprep.subr.bf16.mxu1 %v3303_v3 }
 0x2ed   :  { %3160 = vmatpush3.bf16.msra.mxu1 %v3589_v55 }
 0x2ee   :  { %3161 = vmatprep.subr.bf16.mxu1 %v3303_v3 }
 0x2f0   :  { %2808 = vmatmul.mubr.f32.vlgmr.msra.gmra.mrb[2].mxu1 %v1209_v19 }
 0x2f1   :  { %3163 = vmatpush3.bf16.msra.mxu1 %v3351_v12  ;;  %2842 = vmatprep.mubr.msk.f32.mxu1 %vm3304_vm0, %v3305_v8 }
 0x2f2   :  { %3164 = vmatprep.subr.bf16.mxu1 %v3303_v3 }
 0x2f5   :  { %3166 = vmatpush3.bf16.msra.mxu1 %v3354_v13 }
 0x2f6   :  { %3167 = vmatprep.subr.bf16.mxu1 %v3303_v3 }
 0x2f9   :  { %3169 = vmatpush3.bf16.msra.mxu1 %v3364_v18 }
 0x2fa   :  { %3170 = vmatprep.subr.bf16.mxu1 %v3303_v3 }
 0x2fd   :  { %3172 = vmatpush3.bf16.msra.mxu1 %v3400_v32 }
 0x2fe   :  { %3173 = vmatprep.subr.bf16.mxu1 %v3303_v3 }
 0x301   :  { %3175 = vmatpush3.bf16.msra.mxu1 %v3416_v45 }
 0x302   :  { %3176 = vmatprep.subr.bf16.mxu1 %v3303_v3 }
 0x305   :  { %3178 = vmatpush3.bf16.msra.mxu1 %v3423_v49 }
 0x306   :  { %3179 = vmatprep.subr.bf16.mxu1 %v3303_v3 }
 0x309   :  { %3181 = vmatpush3.bf16.msra.mxu1 %v3425_v50 }
 0x30a   :  { %3182 = vmatprep.subr.bf16.mxu1 %v3303_v3 }
 0x30d   :  { %3184 = vmatpush3.bf16.msra.mxu1 %v3427_v51 }
 0x30e   :  { %3185 = vmatprep.subr.bf16.mxu1 %v3303_v3 }
 0x310   :  { %2843 = vmatmul.mubr.f32.vlgmr.msra.gmra.mrb[2].mxu1 %v1210_v53 }
 0x311   :  { %3187 = vmatpush3.bf16.msra.mxu1 %v3477_v27  ;;  %2877 = vmatprep.mubr.msk.f32.mxu1 %vm3304_vm0, %v3305_v8 }
 0x312   :  { %3188 = vmatprep.subr.bf16.mxu1 %v3303_v3 }
 0x315   :  { %3190 = vmatpush3.bf16.msra.mxu1 %v3479_v28 }
 0x316   :  { %3191 = vmatprep.subr.bf16.mxu1 %v3303_v3 }
 0x319   :  { %3193 = vmatpush3.bf16.msra.mxu1 %v3481_v29 }
 0x31a   :  { %3194 = vmatprep.subr.bf16.mxu1 %v3303_v3 }
 0x31d   :  { %3196 = vmatpush3.bf16.msra.mxu1 %v3484_v30 }
 0x31e   :  { %3197 = vmatprep.subr.bf16.mxu1 %v3303_v3 }
 0x321   :  { %3199 = vmatpush3.bf16.msra.mxu1 %v3486_v33 }
 0x322   :  { %3200 = vmatprep.subr.bf16.mxu1 %v3303_v3 }
 0x325   :  { %3202 = vmatpush3.bf16.msra.mxu1 %v3488_v36 }
 0x326   :  { %3203 = vmatprep.subr.bf16.mxu1 %v3303_v3 }
 0x329   :  { %3205 = vmatpush3.bf16.msra.mxu1 %v3490_v37 }
 0x32a   :  { %3206 = vmatprep.subr.bf16.mxu1 %v3303_v3 }
 0x32d   :  { %3208 = vmatpush3.bf16.msra.mxu1 %v3493_v38 }
 0x32e   :  { %3209 = vmatprep.subr.bf16.mxu1 %v3303_v3 }
 0x330   :  { %2878 = vmatmul.mubr.f32.vlgmr.msra.gmra.mrb[2].mxu1 %v3718_v47 }
 0x331   :  { %3211 = vmatpush3.bf16.msra.mxu1 %v3351_v12  ;;  %2912 = vmatprep.mubr.msk.f32.mxu1 %vm3304_vm0, %v3305_v8 }
 0x332   :  { %3212 = vmatprep.subr.bf16.mxu1 %v3303_v3 }
 0x335   :  { %3214 = vmatpush3.bf16.msra.mxu1 %v3354_v13 }
 0x336   :  { %3215 = vmatprep.subr.bf16.mxu1 %v3303_v3 }
 0x339   :  { %3217 = vmatpush3.bf16.msra.mxu1 %v3364_v18 }
 0x33a   :  { %3218 = vmatprep.subr.bf16.mxu1 %v3303_v3 }
 0x33d   :  { %3220 = vmatpush3.bf16.msra.mxu1 %v3400_v32 }
 0x33e   :  { %3221 = vmatprep.subr.bf16.mxu1 %v3303_v3 }
 0x341   :  { %3223 = vmatpush3.bf16.msra.mxu1 %v3416_v45 }
 0x342   :  { %3224 = vmatprep.subr.bf16.mxu1 %v3303_v3 }
 0x345   :  { %3226 = vmatpush3.bf16.msra.mxu1 %v3423_v49 }
 0x346   :  { %3227 = vmatprep.subr.bf16.mxu1 %v3303_v3 }
 0x349   :  { %3229 = vmatpush3.bf16.msra.mxu1 %v3425_v50 }
 0x34a   :  { %3230 = vmatprep.subr.bf16.mxu1 %v3303_v3 }
 0x34d   :  { %3232 = vmatpush3.bf16.msra.mxu1 %v3427_v51 }
 0x350   :  { %2913 = vmatmul.mubr.f32.vlgmr.msra.gmra.mrb[2].mxu1 %v3718_v47 }
 0x423   :  { %v1764_v12 = vpop.f32.mrb[2].mxu1 }
 0x424   :  { %3277 = vrsqrt.f32 %v1764_v12  ;;  %v2914_v13 = vpop.f32.mrb[3].mxu1  ;;  %vm1768_vm2 = vcmp.gt.f32.partialorder %v1764_v12, 0.0 }
 0x42e   :  { %v3278_v18 = vpop.eup %3277 }
 0x42f   :  { %v1770_v22 = vsel %vm1768_vm2, %v3278_v18, 1.0 }
 0x430   :  { %v1771_v32 = vmul.f32 4.0, %v1770_v22 }
 0x432   :  { %v1773_v45 = vsel %vm675_vm1, %v1771_v32, 0 }
 0x433   :  { %v1841_v49 = vand.u32 4294901760, %v1773_v45 }
 0x435   :  { %v1842_v27 = vsub.f32 %v1773_v45, %v1841_v49 }
 0x437   :  { %v1843_v28 = vand.u32 4294901760, %v1842_v27 }
 0x439   :  { %v1844_v29 = vsub.f32 %v1842_v27, %v1843_v28 }
 0x43b   :  { %v1845_v50 = vand.u32 4294901760, %v1844_v29 }
 0x43d   :  { %2918 = vmatmul.mubr.f32.vlgmr.msra.gmra.mrb[2].mxu0 %v1845_v50 }
 0x43e   :  { %2921 = vmatpush3.msra.mxu0 %v3673_v11  ;;  %2922 = vmatprep.mubr.msk.f32.mxu0 %vm3304_vm0, %v3305_v8 }
 0x43f   :  { %2925 = vmatprep.subr.mxu0 %v3305_v8 }
 0x445   :  { %2923 = vmatmul.mubr.f32.vlgmr.msra.gmra.mrb[2].mxu0 %v1841_v49 }
 0x446   :  { %2926 = vmatpush3.msra.mxu0 %v3665_v59  ;;  %2927 = vmatprep.mubr.msk.f32.mxu0 %vm3304_vm0, %v3305_v8 }
 0x447   :  { %2930 = vmatprep.subr.mxu0 %v3305_v8 }
 0x44d   :  { %2928 = vmatmul.mubr.f32.vlgmr.msra.gmra.mrb[2].mxu0 %v1842_v27 }
 0x44e   :  { %2931 = vmatpush3.msra.mxu0 %v3658_v52  ;;  %2932 = vmatprep.mubr.msk.f32.mxu0 %vm3304_vm0, %v3305_v8 }
 0x44f   :  { %2935 = vmatprep.subr.mxu0 %v3305_v8 }
 0x455   :  { %2933 = vmatmul.mubr.f32.vlgmr.msra.gmra.mrb[2].mxu0 %v1843_v28 }
 0x456   :  { %2936 = vmatpush3.msra.mxu0 %v3669_v63  ;;  %2937 = vmatprep.mubr.msk.f32.mxu0 %vm3304_vm0, %v3305_v8 }
 0x457   :  { %2940 = vmatprep.subr.mxu0 %v3305_v8 }
 0x45d   :  { %2938 = vmatmul.mubr.f32.vlgmr.msra.gmra.mrb[2].mxu0 %v1841_v49 }
 0x45e   :  { %2941 = vmatpush3.msra.mxu0 %v3658_v52  ;;  %2942 = vmatprep.mubr.msk.f32.mxu0 %vm3304_vm0, %v3305_v8 }
 0x465   :  { %2943 = vmatmul.mubr.f32.vlgmr.msra.gmra.mrb[2].mxu0 %v1841_v49 }
 0x538   :  { %v2217_v3 = vpop.f32.mrb[2].mxu0 }
 0x539   :  { %v2221_v51 = vmul.f32 %v2217_v3, %v3714_v39  ;;  %v2944_v30 = vpop.f32.mrb[3].mxu0 }
 0x53b   :  { %2222 = vst [vmem:[#allocation2] sm:$0x1] %v2221_v51 }
 0x53c   :  { %3290 = shalt.err (!%p3287_p4)
}
 0x53d   :  { %s3291_s24 = scalar_lea.hbm %s3849_s3, 16 }
 0x53e   :  { %p3292_p5 = scmp.ne.s32.totalorder %s3849_s3, %s3291_s24  ;;  %p3295_p6 = scmp.lt.u32.totalorder %s3291_s24, %s3849_s3 }
 0x540   :  { %p3297_p7 = pnand %p3295_p6, %p3292_p5 }
 0x542   :  { %3300 = shalt.err (!%p3297_p7)
}
 0x543   :  { %2232 = dma.vmem_to_hbm [thread:$0]  %s2230_s19, 16, %s3849_s3, [#allocation3]  }
 0x544   :  { %3301 = dma.done.wait [#allocation3], 16  }
 0x545   :  { %3302 = vsyncadd [#allocation3], 4294967280 }
 0x546   :  { %2236 = vsyncpa [#allocation3], 1 }

</bundles_post_ra>
